<compile_context>
chip_gen: v7x
topology: tpu7x:2x2x1
jax: 0.10.0
libtpu: 0.0.40
codegen_flags: <defaults>
</compile_context>

<pallas_src>
import functools

import jax
import jax.numpy as jnp
from jax.experimental import pallas as pl
from jax.experimental.pallas import tpu as pltpu


def _round_up(v, m):
    return ((v + m - 1) // m) * m


def _leaky_one_layer_kernel(x_ref, w_ref, b_ref, mask_ref, out_ref, cur_ref, *,
                            beta, threshold, tsteps, tb, rc):
    # x_ref   : (tb, T, Din) f32  natural layout (cast to bf16 in-kernel)
    # w_ref   : (Din, DP)    bf16 classes zero-padded to a full 128-lane tile
    # b_ref   : (1, DP)      f32  zero-padded bias
    # mask_ref: (1, DP)      f32  0 for real classes, -1e30 for padding (hoisted mask)
    # out_ref : (tb, DP)     f32
    # cur_ref : (T, tb, DP)  f32  VMEM scratch: time-major Linear outputs
    T = tsteps
    dp = out_ref.shape[1]
    din = x_ref.shape[2]

    # ---- 1) Linear for ALL timesteps of this batch tile in one MXU matmul (M = tb*T).
    #      Leading-dim collapse is layout-preserving for T % 8 == 0; row order is
    #      batch-major, which the matmul does not care about.
    x2 = x_ref[...].astype(jnp.bfloat16).reshape(tb * T, din)
    cur = jnp.dot(x2, w_ref[...], preferred_element_type=jnp.float32) + b_ref[...]

    # ---- 2) One small relayout: batch-major (tb, T, DP) -> time-major (T, tb, DP). ----
    cur_ref[...] = jnp.transpose(cur.reshape(tb, T, dp), (1, 0, 2))

    # ---- 3) Temporal LIF recurrence (VPU, f32), chunked so state stays in vregs. ----
    thr = jnp.float32(threshold)
    reset0 = bool(0.0 > threshold)          # reset at t=0 (init_leaky() => mem_prev = 0)
    for c in range(tb // rc):
        r0 = c * rc
        cur0 = cur_ref[0, r0:r0 + rc, :]
        mem = cur0 - thr if reset0 else cur0          # peeled first step (beta*0 == 0)
        d = mem - thr                                  # shared: reset value & spike test
        spk = d > 0.0
        spk_sum = spk.astype(jnp.float32)
        for t in range(1, T):
            cur_t = cur_ref[t, r0:r0 + rc, :]
            if beta == 1.0:
                # reset_t == spk_{t-1}; threshold subtraction folded into the select.
                mem = jnp.where(spk, d, mem) + cur_t
            else:
                mem = beta * mem + jnp.where(spk, cur_t - thr, cur_t)
            d = mem - thr
            spk = d > 0.0
            spk_sum = spk_sum + spk.astype(jnp.float32)

        # ---- 4) softmax over classes; padded lanes killed by the additive mask. ----
        logits = spk_sum + mask_ref[...]
        logits = logits - jnp.max(logits, axis=-1, keepdims=True)
        e = jnp.exp(logits)
        out_ref[r0:r0 + rc, :] = e * pl.reciprocal(
            jnp.sum(e, axis=-1, keepdims=True), approx=True)


def leaky_one_layer_forward(x, w, b, *, beta=5.0, threshold=1.0, tb=None):
    """x: [B, T, D_in] f32, w: [D_in, D_out] f32, b: [1, D_out] f32 -> [B, D_out] f32."""
    B, T, Din = x.shape
    Dout = w.shape[1]
    DP = _round_up(max(Dout, 128), 128)                 # lane-dense class dim
    beta_eff = float(min(max(float(beta), 0.0), 1.0))   # snn.Leaky clamps beta to [0,1]
    threshold = float(threshold)

    # Batch-tile: multiple of 8, <=128 rows (vreg-resident state via <=64-row chunks),
    # aiming for matmul M = T*tb >= 256 (MXU height) while keeping nb >= 2.
    if tb is None:
        tb = min(128, _round_up(max(8, -(-256 // T)), 8))
        if tb > 64:
            tb = 128                                     # keep tb a multiple of the chunk
        half = _round_up(max(1, -(-B // 2)), 8)          # allow >=2 grid steps for small B
        tb = max(8, min(tb, half))
    tb = _round_up(tb, 8)
    rc = tb if tb <= 64 else 64                          # recurrence row-chunk
    if tb % rc:
        rc = tb

    B_pad = _round_up(B, tb)
    if B_pad < 2 * tb:
        B_pad = 2 * tb                                   # nb >= 2 -> v7x megacore sharding
    nb = B_pad // tb

    x_p = x if B_pad == B else jnp.pad(x, ((0, B_pad - B), (0, 0), (0, 0)))
    w_p = jnp.zeros((Din, DP), jnp.bfloat16).at[:, :Dout].set(w.astype(jnp.bfloat16))
    b_p = jnp.zeros((1, DP), jnp.float32).at[:, :Dout].set(
        jnp.reshape(b, (1, Dout)).astype(jnp.float32))
    mask = jnp.full((1, DP), -1e30, jnp.float32).at[:, :Dout].set(0.0)

    kernel = functools.partial(
        _leaky_one_layer_kernel,
        beta=beta_eff, threshold=threshold, tsteps=T, tb=tb, rc=rc)

    cost = pl.CostEstimate(
        flops=2 * B_pad * T * Din * DP,
        transcendentals=B_pad * DP,
        bytes_accessed=(x_p.size * 4) + (w_p.size * 2)
                       + (b_p.size + mask.size) * 4 + (B_pad * DP * 4),
    )

    out = pl.pallas_call(
        kernel,
        out_shape=jax.ShapeDtypeStruct((B_pad, DP), jnp.float32),
        grid=(nb,),
        in_specs=[
            pl.BlockSpec((tb, T, Din), lambda i: (i, 0, 0)),   # x, natural layout (f32)
            pl.BlockSpec((Din, DP), lambda i: (0, 0)),         # padded weights (bf16)
            pl.BlockSpec((1, DP), lambda i: (0, 0)),           # padded bias
            pl.BlockSpec((1, DP), lambda i: (0, 0)),           # padded-class additive mask
        ],
        out_specs=pl.BlockSpec((tb, DP), lambda i: (i, 0)),
        scratch_shapes=[pltpu.VMEM((T, tb, DP), jnp.float32)],
        compiler_params=pltpu.CompilerParams(
            dimension_semantics=("parallel",),
        ),
        cost_estimate=cost,
    )(x_p, w_p, b_p, mask)

    return out[:B, :Dout]


def _reference(x, w, b, beta=5.0, threshold=1.0):
    """Pure-JAX reference using the snnTorch update (same bf16 matmul inputs)."""
    beta_eff = min(max(float(beta), 0.0), 1.0)
    B, T, Din = x.shape
    Dout = w.shape[1]
    xb = x.astype(jnp.bfloat16)
    wb = w.astype(jnp.bfloat16)
    bf = jnp.reshape(b, (1, Dout)).astype(jnp.float32)
    mem = jnp.zeros((B, Dout), jnp.float32)
    spk_sum = jnp.zeros((B, Dout), jnp.float32)
    for t in range(T):
        cur = jnp.dot(xb[:, t, :], wb, preferred_element_type=jnp.float32) + bf
        reset = (mem > threshold).astype(jnp.float32)
        mem = beta_eff * mem + cur - reset * threshold
        spk_sum = spk_sum + (mem > threshold).astype(jnp.float32)
    return jax.nn.softmax(spk_sum, axis=1)


if __name__ == "__main__":
    # Module: num_inputs = 28*28 = 784, num_outputs = 10; the subclass sets
    # lif1.beta.data = [5] (clamped to 1.0 inside snn.Leaky's forward) and leaves the
    # threshold at its default 1.0 (the class name notwithstanding, this is what the
    # code does).
    B, T, D_IN, D_OUT = 2, 8, 784, 10
    BETA_PARAM, THRESHOLD = 5.0, 1.0

    key = jax.random.PRNGKey(0)
    kx, kw, kb = jax.random.split(key, 3)

    # Deterministic "parameter init" mimicking nn.Linear's uniform(-1/sqrt(fan_in), +).
    bound = 1.0 / jnp.sqrt(jnp.float32(D_IN))
    w = jax.random.uniform(kw, (D_IN, D_OUT), jnp.float32, -bound, bound)
    b = jax.random.uniform(kb, (1, D_OUT), jnp.float32, -bound, bound)

    # Synthetic input currents over time.
    x = jax.random.normal(kx, (B, T, D_IN), jnp.float32)

    out = leaky_one_layer_forward(x, w, b, beta=BETA_PARAM, threshold=THRESHOLD)
    out = jax.block_until_ready(out)

    ref = _reference(x, w, b, beta=BETA_PARAM, threshold=THRESHOLD)
    assert out.shape == (B, D_OUT)
    assert bool(jnp.allclose(out, ref, atol=2e-3, rtol=2e-3)), (out, ref)

    print("KERNEL_OK")
</pallas_src>

<mosaic_0001>
module attributes {stable_mosaic.version = 11 : i64} {
  func.func @_leaky_one_layer_kernel(%arg0: i32, %arg1: memref<8x8x784xf32, #tpu.memory_space<vmem>>, %arg2: memref<784x128xbf16, #tpu.memory_space<vmem>>, %arg3: memref<1x128xf32, #tpu.memory_space<vmem>>, %arg4: memref<1x128xf32, #tpu.memory_space<vmem>>, %arg5: memref<8x128xf32, #tpu.memory_space<vmem>>, %arg6: memref<8x8x128xf32, #tpu.memory_space<vmem>>) attributes {dimension_semantics = [#tpu.dimension_semantics<parallel>], iteration_bounds = array<i64: 2>, scalar_prefetch = 0 : i64, scratch_operands = 1 : i64, tpu.core_type = #tpu.core_type<tc>, window_params = [{transform_indices = @transform_0, window_bounds = array<i64: 8, 8, 784>}, {pipeline_mode = #tpu.pipeline_mode<synchronous>, transform_indices = @transform_1, window_bounds = array<i64: 784, 128>}, {pipeline_mode = #tpu.pipeline_mode<synchronous>, transform_indices = @transform_2, window_bounds = array<i64: 1, 128>}, {pipeline_mode = #tpu.pipeline_mode<synchronous>, transform_indices = @transform_3, window_bounds = array<i64: 1, 128>}, {transform_indices = @transform_4, window_bounds = array<i64: 8, 128>}]} {
    %c0 = arith.constant 0 : index
    %c0_0 = arith.constant 0 : index
    %c0_1 = arith.constant 0 : index
    %0 = vector.load %arg1[%c0, %c0_0, %c0_1] : memref<8x8x784xf32, #tpu.memory_space<vmem>>, vector<8x8x784xf32>
    %1 = arith.truncf %0 : vector<8x8x784xf32> to vector<8x8x784xbf16>
    %2 = vector.shape_cast %1 : vector<8x8x784xbf16> to vector<64x784xbf16>
    %c0_2 = arith.constant 0 : index
    %c0_3 = arith.constant 0 : index
    %3 = vector.load %arg2[%c0_2, %c0_3] : memref<784x128xbf16, #tpu.memory_space<vmem>>, vector<784x128xbf16>
    %cst = arith.constant dense<0.000000e+00> : vector<64x128xf32>
    %4 = tpu.matmul %2, %3, %cst {dimension_numbers = #tpu.dot_dimension_numbers<[1], [0], [0], [1], [0, 0, 1, 1], [], []>} : vector<64x784xbf16>, vector<784x128xbf16>, vector<64x128xf32> -> vector<64x128xf32>
    %c0_4 = arith.constant 0 : index
    %c0_5 = arith.constant 0 : index
    %5 = vector.load %arg3[%c0_4, %c0_5] : memref<1x128xf32, #tpu.memory_space<vmem>>, vector<1x128xf32>
    %6 = vector.broadcast %5 : vector<1x128xf32> to vector<64x128xf32>
    %7 = arith.addf %4, %6 : vector<64x128xf32>
    %8 = vector.shape_cast %7 : vector<64x128xf32> to vector<8x8x128xf32>
    %9 = tpu.transpose %8, [1, 0, 2] : vector<8x8x128xf32> -> vector<8x8x128xf32>
    %c0_6 = arith.constant 0 : index
    %c0_7 = arith.constant 0 : index
    %c0_8 = arith.constant 0 : index
    %10 = vector.load %arg6[%c0_6, %c0_7, %c0_8] : memref<8x8x128xf32, #tpu.memory_space<vmem>>, vector<8x8x128xf32>
    tpu.vector_store %arg6[%c0_6, %c0_7, %c0_8], %9 {strides = array<i32>} : memref<8x8x128xf32, #tpu.memory_space<vmem>>, vector<8x8x128xf32>,
    %c0_9 = arith.constant 0 : index
    %c0_10 = arith.constant 0 : index
    %c0_11 = arith.constant 0 : index
    %11 = vector.load %arg6[%c0_9, %c0_10, %c0_11] : memref<8x8x128xf32, #tpu.memory_space<vmem>>, vector<1x8x128xf32>
    %12 = vector.shape_cast %11 : vector<1x8x128xf32> to vector<8x128xf32>
    %cst_12 = arith.constant 1.000000e+00 : f32
    %13 = vector.broadcast %cst_12 : f32 to vector<8x128xf32>
    %14 = arith.subf %12, %13 : vector<8x128xf32>
    %cst_13 = arith.constant 0.000000e+00 : f32
    %15 = vector.broadcast %cst_13 : f32 to vector<8x128xf32>
    %16 = arith.cmpf ogt, %14, %15 : vector<8x128xf32>
    %17 = arith.extui %16 : vector<8x128xi1> to vector<8x128xi32>
    %18 = arith.sitofp %17 : vector<8x128xi32> to vector<8x128xf32>
    %c1 = arith.constant 1 : index
    %c0_14 = arith.constant 0 : index
    %c0_15 = arith.constant 0 : index
    %19 = vector.load %arg6[%c1, %c0_14, %c0_15] : memref<8x8x128xf32, #tpu.memory_space<vmem>>, vector<1x8x128xf32>
    %20 = vector.shape_cast %19 : vector<1x8x128xf32> to vector<8x128xf32>
    %21 = arith.select %16, %14, %12 : vector<8x128xi1>, vector<8x128xf32>
    %22 = arith.addf %21, %20 : vector<8x128xf32>
    %cst_16 = arith.constant 1.000000e+00 : f32
    %23 = vector.broadcast %cst_16 : f32 to vector<8x128xf32>
    %24 = arith.subf %22, %23 : vector<8x128xf32>
    %cst_17 = arith.constant 0.000000e+00 : f32
    %25 = vector.broadcast %cst_17 : f32 to vector<8x128xf32>
    %26 = arith.cmpf ogt, %24, %25 : vector<8x128xf32>
    %27 = arith.extui %26 : vector<8x128xi1> to vector<8x128xi32>
    %28 = arith.sitofp %27 : vector<8x128xi32> to vector<8x128xf32>
    %29 = arith.addf %18, %28 : vector<8x128xf32>
    %c2 = arith.constant 2 : index
    %c0_18 = arith.constant 0 : index
    %c0_19 = arith.constant 0 : index
    %30 = vector.load %arg6[%c2, %c0_18, %c0_19] : memref<8x8x128xf32, #tpu.memory_space<vmem>>, vector<1x8x128xf32>
    %31 = vector.shape_cast %30 : vector<1x8x128xf32> to vector<8x128xf32>
    %32 = arith.select %26, %24, %22 : vector<8x128xi1>, vector<8x128xf32>
    %33 = arith.addf %32, %31 : vector<8x128xf32>
    %cst_20 = arith.constant 1.000000e+00 : f32
    %34 = vector.broadcast %cst_20 : f32 to vector<8x128xf32>
    %35 = arith.subf %33, %34 : vector<8x128xf32>
    %cst_21 = arith.constant 0.000000e+00 : f32
    %36 = vector.broadcast %cst_21 : f32 to vector<8x128xf32>
    %37 = arith.cmpf ogt, %35, %36 : vector<8x128xf32>
    %38 = arith.extui %37 : vector<8x128xi1> to vector<8x128xi32>
    %39 = arith.sitofp %38 : vector<8x128xi32> to vector<8x128xf32>
    %40 = arith.addf %29, %39 : vector<8x128xf32>
    %c3 = arith.constant 3 : index
    %c0_22 = arith.constant 0 : index
    %c0_23 = arith.constant 0 : index
    %41 = vector.load %arg6[%c3, %c0_22, %c0_23] : memref<8x8x128xf32, #tpu.memory_space<vmem>>, vector<1x8x128xf32>
    %42 = vector.shape_cast %41 : vector<1x8x128xf32> to vector<8x128xf32>
    %43 = arith.select %37, %35, %33 : vector<8x128xi1>, vector<8x128xf32>
    %44 = arith.addf %43, %42 : vector<8x128xf32>
    %cst_24 = arith.constant 1.000000e+00 : f32
    %45 = vector.broadcast %cst_24 : f32 to vector<8x128xf32>
    %46 = arith.subf %44, %45 : vector<8x128xf32>
    %cst_25 = arith.constant 0.000000e+00 : f32
    %47 = vector.broadcast %cst_25 : f32 to vector<8x128xf32>
    %48 = arith.cmpf ogt, %46, %47 : vector<8x128xf32>
    %49 = arith.extui %48 : vector<8x128xi1> to vector<8x128xi32>
    %50 = arith.sitofp %49 : vector<8x128xi32> to vector<8x128xf32>
    %51 = arith.addf %40, %50 : vector<8x128xf32>
    %c4 = arith.constant 4 : index
    %c0_26 = arith.constant 0 : index
    %c0_27 = arith.constant 0 : index
    %52 = vector.load %arg6[%c4, %c0_26, %c0_27] : memref<8x8x128xf32, #tpu.memory_space<vmem>>, vector<1x8x128xf32>
    %53 = vector.shape_cast %52 : vector<1x8x128xf32> to vector<8x128xf32>
    %54 = arith.select %48, %46, %44 : vector<8x128xi1>, vector<8x128xf32>
    %55 = arith.addf %54, %53 : vector<8x128xf32>
    %cst_28 = arith.constant 1.000000e+00 : f32
    %56 = vector.broadcast %cst_28 : f32 to vector<8x128xf32>
    %57 = arith.subf %55, %56 : vector<8x128xf32>
    %cst_29 = arith.constant 0.000000e+00 : f32
    %58 = vector.broadcast %cst_29 : f32 to vector<8x128xf32>
    %59 = arith.cmpf ogt, %57, %58 : vector<8x128xf32>
    %60 = arith.extui %59 : vector<8x128xi1> to vector<8x128xi32>
    %61 = arith.sitofp %60 : vector<8x128xi32> to vector<8x128xf32>
    %62 = arith.addf %51, %61 : vector<8x128xf32>
    %c5 = arith.constant 5 : index
    %c0_30 = arith.constant 0 : index
    %c0_31 = arith.constant 0 : index
    %63 = vector.load %arg6[%c5, %c0_30, %c0_31] : memref<8x8x128xf32, #tpu.memory_space<vmem>>, vector<1x8x128xf32>
    %64 = vector.shape_cast %63 : vector<1x8x128xf32> to vector<8x128xf32>
    %65 = arith.select %59, %57, %55 : vector<8x128xi1>, vector<8x128xf32>
    %66 = arith.addf %65, %64 : vector<8x128xf32>
    %cst_32 = arith.constant 1.000000e+00 : f32
    %67 = vector.broadcast %cst_32 : f32 to vector<8x128xf32>
    %68 = arith.subf %66, %67 : vector<8x128xf32>
    %cst_33 = arith.constant 0.000000e+00 : f32
    %69 = vector.broadcast %cst_33 : f32 to vector<8x128xf32>
    %70 = arith.cmpf ogt, %68, %69 : vector<8x128xf32>
    %71 = arith.extui %70 : vector<8x128xi1> to vector<8x128xi32>
    %72 = arith.sitofp %71 : vector<8x128xi32> to vector<8x128xf32>
    %73 = arith.addf %62, %72 : vector<8x128xf32>
    %c6 = arith.constant 6 : index
    %c0_34 = arith.constant 0 : index
    %c0_35 = arith.constant 0 : index
    %74 = vector.load %arg6[%c6, %c0_34, %c0_35] : memref<8x8x128xf32, #tpu.memory_space<vmem>>, vector<1x8x128xf32>
    %75 = vector.shape_cast %74 : vector<1x8x128xf32> to vector<8x128xf32>
    %76 = arith.select %70, %68, %66 : vector<8x128xi1>, vector<8x128xf32>
    %77 = arith.addf %76, %75 : vector<8x128xf32>
    %cst_36 = arith.constant 1.000000e+00 : f32
    %78 = vector.broadcast %cst_36 : f32 to vector<8x128xf32>
    %79 = arith.subf %77, %78 : vector<8x128xf32>
    %cst_37 = arith.constant 0.000000e+00 : f32
    %80 = vector.broadcast %cst_37 : f32 to vector<8x128xf32>
    %81 = arith.cmpf ogt, %79, %80 : vector<8x128xf32>
    %82 = arith.extui %81 : vector<8x128xi1> to vector<8x128xi32>
    %83 = arith.sitofp %82 : vector<8x128xi32> to vector<8x128xf32>
    %84 = arith.addf %73, %83 : vector<8x128xf32>
    %c7 = arith.constant 7 : index
    %c0_38 = arith.constant 0 : index
    %c0_39 = arith.constant 0 : index
    %85 = vector.load %arg6[%c7, %c0_38, %c0_39] : memref<8x8x128xf32, #tpu.memory_space<vmem>>, vector<1x8x128xf32>
    %86 = vector.shape_cast %85 : vector<1x8x128xf32> to vector<8x128xf32>
    %87 = arith.select %81, %79, %77 : vector<8x128xi1>, vector<8x128xf32>
    %88 = arith.addf %87, %86 : vector<8x128xf32>
    %cst_40 = arith.constant 1.000000e+00 : f32
    %89 = vector.broadcast %cst_40 : f32 to vector<8x128xf32>
    %90 = arith.subf %88, %89 : vector<8x128xf32>
    %cst_41 = arith.constant 0.000000e+00 : f32
    %91 = vector.broadcast %cst_41 : f32 to vector<8x128xf32>
    %92 = arith.cmpf ogt, %90, %91 : vector<8x128xf32>
    %93 = arith.extui %92 : vector<8x128xi1> to vector<8x128xi32>
    %94 = arith.sitofp %93 : vector<8x128xi32> to vector<8x128xf32>
    %95 = arith.addf %84, %94 : vector<8x128xf32>
    %c0_42 = arith.constant 0 : index
    %c0_43 = arith.constant 0 : index
    %96 = vector.load %arg4[%c0_42, %c0_43] : memref<1x128xf32, #tpu.memory_space<vmem>>, vector<1x128xf32>
    %97 = vector.broadcast %96 : vector<1x128xf32> to vector<8x128xf32>
    %98 = arith.addf %95, %97 : vector<8x128xf32>
    %cst_44 = arith.constant dense<0xFF800000> : vector<8xf32>
    %99 = vector.multi_reduction <maximumf>, %98, %cst_44 [1] : vector<8x128xf32> to vector<8xf32>
    %100 = vector.shape_cast %99 : vector<8xf32> to vector<8x1xf32>
    %101 = vector.broadcast %100 : vector<8x1xf32> to vector<8x128xf32>
    %102 = arith.subf %98, %101 : vector<8x128xf32>
    %103 = math.exp %102 : vector<8x128xf32>
    %cst_45 = arith.constant dense<0.000000e+00> : vector<8xf32>
    %104 = vector.multi_reduction <add>, %103, %cst_45 [1] : vector<8x128xf32> to vector<8xf32>
    %105 = vector.shape_cast %104 : vector<8xf32> to vector<8x1xf32>
    %106 = tpu.reciprocal %105 {approx = true} : vector<8x1xf32> -> vector<8x1xf32>
    %107 = vector.broadcast %106 : vector<8x1xf32> to vector<8x128xf32>
    %108 = arith.mulf %103, %107 : vector<8x128xf32>
    %c0_46 = arith.constant 0 : index
    %c0_47 = arith.constant 0 : index
    %109 = vector.load %arg5[%c0_46, %c0_47] : memref<8x128xf32, #tpu.memory_space<vmem>>, vector<8x128xf32>
    tpu.vector_store %arg5[%c0_46, %c0_47], %108 {strides = array<i32>} : memref<8x128xf32, #tpu.memory_space<vmem>>, vector<8x128xf32>,
    return
  }
  func.func @transform_0(%arg0: i32) -> (i32, i32, i32) {
    %c0_i32 = arith.constant 0 : i32
    %c0_i32_0 = arith.constant 0 : i32
    %c0_i32_1 = arith.constant 0 : i32
    return %arg0, %c0_i32, %c0_i32_0 : i32, i32, i32
  }
  func.func @transform_1(%arg0: i32) -> (i32, i32) {
    %c0_i32 = arith.constant 0 : i32
    %c0_i32_0 = arith.constant 0 : i32
    %c0_i32_1 = arith.constant 0 : i32
    return %c0_i32, %c0_i32_0 : i32, i32
  }
  func.func @transform_2(%arg0: i32) -> (i32, i32) {
    %c0_i32 = arith.constant 0 : i32
    %c0_i32_0 = arith.constant 0 : i32
    %c0_i32_1 = arith.constant 0 : i32
    return %c0_i32, %c0_i32_0 : i32, i32
  }
  func.func @transform_3(%arg0: i32) -> (i32, i32) {
    %c0_i32 = arith.constant 0 : i32
    %c0_i32_0 = arith.constant 0 : i32
    %c0_i32_1 = arith.constant 0 : i32
    return %c0_i32, %c0_i32_0 : i32, i32
  }
  func.func @transform_4(%arg0: i32) -> (i32, i32) {
    %c0_i32 = arith.constant 0 : i32
    %c0_i32_0 = arith.constant 0 : i32
    return %arg0, %c0_i32 : i32, i32
  }
}

</mosaic_0001>

<bundles_post_ra>
// kernel: tpu_custom_call.1
= control target key start
LH: loop header
LB: loop body
LE: loop exit
PB: predicated region body
PF: predicated region fallthrough
CT: control target
= control target key end

     0   :  { %9 = vsyncpa [#allocation4], 0  ;;  %s2366_s0 = inlined_call_operand.hbm [shape: f32[16,8,784], index: 0, kind: input, shape index: {}]   ;;  %s2367_s1 = inlined_call_operand.hbm [shape: bf16[784,128], index: 1, kind: input, shape index: {}]   ;;  %s2368_s2 = inlined_call_operand.vmem [shape: f32[1,128], index: 2, kind: input, shape index: {}]   ;;  %s2369_s3 = inlined_call_operand.vmem [shape: f32[1,128], index: 3, kind: input, shape index: {}]   ;;  %s2370_s4 = inlined_call_operand.hbm [shape: f32[16,128], index: 4, kind: output, shape index: {}]  }
   0x1   :  { %11 = vsyncpa [#allocation4 + $0x1], 0 }
   0x2   :  { %12 = vsyncpa [#allocation7], 0 }
   0x3   :  { %13 = vsyncpa [#allocation5], 0 }
   0x4   :  { %15 = vsyncpa [#allocation5 + $0x1], 0  ;;  %s2083_s15 = smov 0   ;;  %s2085_s16 = smov 0  }
   0x5   :  { %s2087_s17 = smov 0   ;;  %s2089_s18 = smov 0  }
   0x6 LB: > { %s2104_s19 = sadd.s32 4294967295, %s2046_s18   ;;  %s1506_s20 = sadd.s32 4294967294, %s2046_s18   ;;  %s2046_s18 = sphi %s2089_s18, %s2390_s18   ;;  %s2042_s17 = sphi %s2087_s17, %s2389_s17   ;;  %s2038_s16 = sphi %s2085_s16, %s2388_s16   ;;  %s2034_s15 = sphi %s2083_s15, %s2387_s15  }
   0x7   : > { %p41_p0 = scmp.ne.s32.totalorder %s2038_s16, %s2034_s15  ;;  %p2371_p1 = scmp.eq.s32.totalorder %s2104_s19, 0 }
   0x8   : > { %p134_p3 = scmp.eq.s32.totalorder %s1506_s20, 1  ;;  %p1507_p5 = scmp.ge.s32.totalorder %s2046_s18, 1 }
   0x9   : > { %p2113_p4 = por %p2371_p1, %p41_p0  ;;  %p141_p7 = scmp.lt.s32.totalorder %s2046_s18, 3 }
   0xa   : > { %p2118_p6 = por %p134_p3, %p41_p0  ;;  %s2048_s24 = smov [#allocation6]  }
   0xb   : > { %s2374_s21 = scalar_select %p2113_p4, 1, 0 }
   0xc   : > { %s2375_s22 = scalar_select %p2118_p6, 1, 0 }
   0xd   : > { %p2123_p8 = pnand %p1507_p5, %p141_p7  ;;  %s153_s25 = sshll.u32 %s2048_s24, 4  ;;  %s2127_s25 = int_to_ptr.vmem [resolvable:$true] %s153_s25 }
   0xe   : > { %s2139_s27 = sadd.s32 1, %s2046_s18   ;;  %s28_s28 = sadd.s32 1, %s2042_s17 }
   0xf   : > { %s2376_s23 = scalar_select %p2123_p8, 1, 0 }
  0x10   : > { %p1809_p9 = pneg %p2123_p8  ;;  %s25_s29 = ssub.s32 %s2046_s18, %s2139_s27 }
  0x11   : > { %s1918_s6 = scalar_lea.hbm %s2367_s1, 6272 }
  0x12   : > { %p2134_p11 = pnand %p1809_p9, %p2371_p1  ;;  %p1919_p12 = scmp.ne.s32.totalorder %s2367_s1, %s1918_s6 }
  0x13   : > { %p1925_p5 = scmp.lt.u32.totalorder %s1918_s6, %s2367_s1 }
  0x14   : > { %p1920_p13 = pneg %p2134_p11 }
  0x16   : > { %p1921_p0 = pnand %p1920_p13, %p1919_p12 }
  0x18   : > { %p1922_p3 = pneg %p1921_p0 }
  0x1a   : > { %p1927_p7 = pnand %p1925_p5, %p1922_p3 }
  0x1c   : > { %1930 = shalt.err (!%p1927_p7)
}
  0x1d   : > { %s1931_s11 = scalar_lea.vmem %s2127_s25, 6272  ;;  %p1939_p2 = scmp.lt.s32.totalorder %s2127_s25, %s2127_s25 }
  0x1e   : > { %p1932_p9 = scmp.ne.s32.totalorder %s2127_s25, %s1931_s11  ;;  %p1940_p6 = scmp.lt.s32.totalorder %s1931_s11, %s1931_s11 }
  0x20   : > { %p1934_p10 = pnand %p1932_p9, %p1920_p13  ;;  %p1941_p4 = por %p1940_p6, %p1939_p2 }
  0x22   : > { %p1935_p1 = pneg %p1934_p10 }
  0x24   : > { %p1942_p8 = pnand %p1941_p4, %p1935_p1 }
  0x26   : > { %1945 = shalt.err (!%p1942_p8)
}
  0x27   : > { %s2049_s12 = smov 64   ;;  %s2050_s13 = smov 4  }
  0x28   : > { %1812 = dma.hbm_to_vmem [thread:$0]  (!%p2134_p11), %s2367_s1, 6272, %s2127_s25, [#allocation7], %s2049_s12, %s2049_s12, %s2050_s13  }
  0x29   : > { %p26_p2 = scmp.eq.s32.totalorder %s25_s29, 0  ;;  %p35_p1 = scmp.ne.s32.totalorder %s2042_s17, %s2038_s16 }
  0x2a   : > { %p36_p4 = scmp.eq.s32.totalorder %s2046_s18, 0  ;;  %p1822_p6 = scmp.lt.s32.totalorder %s2046_s18, 2 }
  0x2b   : > { %s2170_s24 = scalar_select %p26_p2, %s2042_s17, %s28_s28  }
  0x2c   : > { %p37_p8 = por %p36_p4, %p35_p1  ;;  %p2378_p10 = scmp.eq.s32.totalorder %s2104_s19, 1 }
  0x2d   : > { %s173_s5 = sand.u32 1, %s2042_s17   ;;  %s1799_s6 = smul.u32 7168, %s2046_s18 }
  0x2e   : > { %p2174_p12 = por %p2378_p10, %p35_p1  ;;  %s1798_s7 = smul.u32 448, %s173_s5 }
  0x2f   : > { %s2183_s9 = scalar_lea.hbm %s2366_s0, %s1799_s6  ;;  %p2185_p11 = pnand %p1822_p6, %p37_p8 }
  0x30   : > { %s177_s28 = scalar_lea.vmem [#allocation3], %s1798_s7  ;;  %s2191_s10 = scalar_lea.sflag [#allocation4], %s173_s5 }
  0x31   : > { %s185_s29 = sshll.u32 %s177_s28, 4  ;;  %s1946_s11 = scalar_lea.hbm %s2183_s9, 7168  ;;  %s2189_s29 = int_to_ptr.vmem [resolvable:$true] %s185_s29 }
  0x32   : > { %p1947_p13 = scmp.ne.s32.totalorder %s2183_s9, %s1946_s11  ;;  %p1948_p0 = pneg %p2185_p11 }
  0x33   : > { %s1951_s14 = scalar_lea.hbm %s2366_s0, 14336  ;;  %p1952_p7 = scmp.lt.u32.totalorder %s2183_s9, %s2366_s0 }
  0x34   : > { %p1949_p3 = pnand %p1948_p0, %p1947_p13  ;;  %p1953_p9 = scmp.lt.u32.totalorder %s1951_s14, %s1946_s11 }
  0x35   : > { %p1955_p1 = scmp.lt.u32.totalorder %s1946_s11, %s2183_s9 }
  0x36   : > { %p1950_p5 = pneg %p1949_p3  ;;  %p1954_p2 = por %p1953_p9, %p1952_p7 }
  0x38   : > { %p1956_p4 = por %p1955_p1, %p1954_p2 }
  0x3a   : > { %p1957_p6 = pnand %p1956_p4, %p1950_p5 }
  0x3c   : > { %1960 = shalt.err (!%p1957_p6)
}
  0x3d   : > { %s1961_s5 = scalar_lea.vmem %s2189_s29, 7168  ;;  %s2051_s7 = smov [#allocation3]  }
  0x3e   : > { %p1962_p8 = scmp.ne.s32.totalorder %s2189_s29, %s1961_s5  ;;  %s1966_s26 = sshll.u32 %s2051_s7, 4  ;;  %s1967_s26 = int_to_ptr.vmem [resolvable:$false] %s1966_s26 }
  0x3f   : > { %s1968_s8 = scalar_lea.vmem %s1967_s26, 14336  ;;  %p1969_p3 = scmp.lt.s32.totalorder %s2189_s29, %s1967_s26 }
  0x40   : > { %p1964_p10 = pnand %p1962_p8, %p1948_p0  ;;  %p1970_p7 = scmp.lt.s32.totalorder %s1968_s8, %s1961_s5 }
  0x42   : > { %p1965_p13 = pneg %p1964_p10  ;;  %p1971_p9 = por %p1970_p7, %p1969_p3 }
  0x44   : > { %p1972_p2 = pnand %p1971_p9, %p1965_p13 }
  0x46   : > { %1975 = shalt.err (!%p1972_p2)
}
  0x47   : > { %s2052_s28 = smov 896   ;;  %s2053_s11 = smov 56  }
  0x48   : > { %1816 = dma.hbm_to_vmem [thread:$0]  (!%p2185_p11), %s2183_s9, 7168, %s2189_s29, %s2191_s10, %s2052_s28, %s2052_s28, %s2053_s11  }
  0x49   : > { %p2381_p0 = scmp.ne.s32.totalorder %s2376_s23, 0 }
  0x4a   : > { %s2222_s12 = sand.u32 (!%p2381_p0), 1, %s2038_s16   ;;  %p2382_p5 = scmp.ne.s32.totalorder (!%p2381_p0), %s2374_s21, 0 }
  0x4b   : > { %197 = sbr.rel (%p2381_p0) target bundleno = 776 (0x308), region = 36  ;;  %s200_s14 = scalar_lea.sflag (!%p2381_p0), [#allocation4], %s2222_s12 }
  0x4c   : > { %s1800_s13 = smul.u32 (!%p2381_p0), 448, %s2222_s12 }
  0x4e   : > { %s2226_s20 = scalar_lea.vmem (!%p2381_p0), [#allocation3], %s1800_s13 }
  0x52   : > { %2021 = dma.done.wait (%p2382_p5), %s200_s14, 7168  }
  0x53   : > { %2023 = vsyncadd (%p2382_p5), %s200_s14, 4294960128  ;;  %p2383_p11 = scmp.eq.s32.totalorder %s2104_s19, 0 }
  0x55   : > { %2025 = dma.done.wait (%p2383_p11), [#allocation7], 6272   ;;  %p2384_p1 = pmov %p2383_p11 }
  0x56   : > { %v1865_v0 = vld [vmem:[#allocation6 + $0x40] sm:$0xff]   ;;  %v1869_v4 = vld [vmem:[#allocation6 + $0x48] sm:$0xff]   ;;  %v1873_v8 = vld [vmem:[#allocation6 + $0x50] sm:$0xff]   ;;  %vm909_vm0 = vcmask 130048   ;;  %s1515_s29 = sshll.u32 %s2222_s12, 3  ;;  %s1616_s10 = sshll.u32 %s2104_s19, 7 }
  0x57   : > { %2027 = vsyncadd (%p2384_p1), [#allocation7], 4294961024  ;;  %v1866_v1 = vld [vmem:[#allocation6 + $0xc0] sm:$0xff]   ;;  %1647 = vmatprep.subr.bf16.mxu0 %v1865_v0  ;;  %v1870_v5 = vld [vmem:[#allocation6 + $0xc8] sm:$0xff]   ;;  %s231_s6 = scalar_lea.vmem [#allocation8], %s1515_s29  ;;  %s2322_s8 = scalar_lea.hbm %s2370_s4, %s1616_s10 }
  0x58   : > { %v1867_v2 = vld [vmem:[#allocation6] sm:$0xff]   ;;  %1687 = vmatprep.subr.bf16.mxu1 %v1866_v1  ;;  %v1871_v6 = vld [vmem:[#allocation6 + $0x8] sm:$0xff]   ;;  %v1874_v9 = vld [vmem:[#allocation6 + $0xd0] sm:$0xff]   ;;  %s1426_s5 = sshll.u32 %s231_s6, 4  ;;  %s1413_s28 = scalar_lea.sflag [#allocation5], %s2222_s12  ;;  %s2324_s5 = int_to_ptr.vmem [resolvable:$true] %s1426_s5 }
  0x59   : > { %v1868_v3 = vld [vmem:[#allocation6 + $0x80] sm:$0xff]   ;;  %1648 = vmatpush3.bf16.msra.mxu0 %v1867_v2  ;;  %v1872_v7 = vld [vmem:[#allocation6 + $0x88] sm:$0xff]   ;;  %v1875_v10 = vld [vmem:[#allocation6 + $0x10] sm:$0xff]   ;;  %s1976_s11 = scalar_lea.vmem %s2324_s5, 128  ;;  %s2057_s19 = smov [#allocation8]  }
  0x5a   : > { %1688 = vmatpush3.bf16.msra.mxu1 %v1868_v3  ;;  %1649 = vmatprep.subr.bf16.mxu0 %v1869_v4  ;;  %v1876_v11 = vld [vmem:[#allocation6 + $0x90] sm:$0xff]   ;;  %v1877_v12 = vld [vmem:[#allocation6 + $0x58] sm:$0xff]   ;;  %v1881_v16 = vld [vmem:[#allocation6 + $0x60] sm:$0xff]   ;;  %p1977_p4 = scmp.ne.s32.totalorder %s2324_s5, %s1976_s11  ;;  %s1980_s13 = sshll.u32 %s2057_s19, 4  ;;  %s1981_s13 = int_to_ptr.vmem [resolvable:$false] %s1980_s13 }
  0x5b   : > { %1689 = vmatprep.subr.bf16.mxu1 %v1870_v5  ;;  %v1878_v13 = vld [vmem:[#allocation6 + $0xd8] sm:$0xff]   ;;  %v1882_v17 = vld [vmem:[#allocation6 + $0xe0] sm:$0xff]   ;;  %v1885_v20 = vld [vmem:[#allocation6 + $0x68] sm:$0xff]   ;;  %s1982_s14 = scalar_lea.vmem %s1981_s13, 256  ;;  %p1983_p10 = scmp.lt.s32.totalorder %s2324_s5, %s1981_s13 }
  0x5c   : > { %v1879_v14 = vld [vmem:[#allocation6 + $0x18] sm:$0xff]   ;;  %v1883_v18 = vld [vmem:[#allocation6 + $0x20] sm:$0xff]   ;;  %v1886_v21 = vld [vmem:[#allocation6 + $0xe8] sm:$0xff]   ;;  %p1978_p6 = pnand %p1977_p4, %p2174_p12  ;;  %p1984_p13 = scmp.lt.s32.totalorder %s1982_s14, %s1976_s11 }
  0x5d   : > { %1650 = vmatpush3.bf16.msra.mxu0 %v1871_v6  ;;  %v1880_v15 = vld [vmem:[#allocation6 + $0x98] sm:$0xff]   ;;  %v1884_v19 = vld [vmem:[#allocation6 + $0xa0] sm:$0xff]   ;;  %v1887_v22 = vld [vmem:[#allocation6 + $0x28] sm:$0xff]  }
  0x5e   : > { %1690 = vmatpush3.bf16.msra.mxu1 %v1872_v7  ;;  %1651 = vmatprep.subr.bf16.mxu0 %v1873_v8  ;;  %v1888_v23 = vld [vmem:[#allocation6 + $0xa8] sm:$0xff]   ;;  %v1889_v24 = vld [vmem:[#allocation6 + $0x70] sm:$0xff]   ;;  %v1893_v28 = vld [vmem:[#allocation6 + $0x78] sm:$0xff]   ;;  %p1979_p8 = pneg %p1978_p6  ;;  %p1985_p3 = por %p1984_p13, %p1983_p10 }
  0x5f   : > { %1691 = vmatprep.subr.bf16.mxu1 %v1874_v9  ;;  %v1890_v25 = vld [vmem:[#allocation6 + $0xf0] sm:$0xff]   ;;  %v1894_v29 = vld [vmem:[#allocation6 + $0xf8] sm:$0xff]   ;;  %v235_v32 = vld [vmem:[%s2226_s20 + $0x8] sm:$0xff] }
  0x60   : > { %v1891_v26 = vld [vmem:[#allocation6 + $0x30] sm:$0xff]   ;;  %v1895_v30 = vld [vmem:[#allocation6 + $0x38] sm:$0xff]   ;;  %v242_v33 = vld [vmem:[%s2226_s20 + $0x40] sm:$0xff]  ;;  %p1986_p7 = pnand %p1985_p3, %p1979_p8 }
  0x61   : > { %1652 = vmatpush3.bf16.msra.mxu0 %v1875_v10  ;;  %v1892_v27 = vld [vmem:[#allocation6 + $0xb0] sm:$0xff]   ;;  %v1896_v31 = vld [vmem:[#allocation6 + $0xb8] sm:$0xff]   ;;  %v1620_v35 = vpack.c.bf16 %v242_v33, %v235_v32  ;;  %v234_v37 = vld [vmem:[%s2226_s20] sm:$0xff] }
  0x62   : > { %1692 = vmatpush3.bf16.msra.mxu1 %v1876_v11  ;;  %1653 = vmatprep.subr.bf16.mxu0 %v1877_v12  ;;  %v237_v34 = vld [vmem:[%s2226_s20 + $0x18] sm:$0xff]  ;;  %v244_v36 = vld [vmem:[%s2226_s20 + $0x50] sm:$0xff]  ;;  %v243_v42 = vld [vmem:[%s2226_s20 + $0x48] sm:$0xff] }
  0x63   : > { %1693 = vmatprep.subr.bf16.mxu1 %v1878_v13  ;;  %v241_v38 = vld [vmem:[%s2226_s20 + $0x38] sm:$0xff]  ;;  %v1622_v39 = vpack.c.bf16 %v244_v36, %v237_v34  ;;  %v236_v41 = vld [vmem:[%s2226_s20 + $0x10] sm:$0xff]  ;;  %954 = vmatprep.mubr.bf16.mxu0 %v1620_v35  ;;  %v1897_v44 = vld [vmem:[#allocation6 + $0x140] sm:$0xff]  }
  0x64   : > { %v1619_v40 = vpack.c.bf16 %v241_v38, %v234_v37  ;;  %v1621_v43 = vpack.c.bf16 %v243_v42, %v236_v41  ;;  %v1898_v45 = vld [vmem:[#allocation6 + $0x100] sm:$0xff]   ;;  %v1899_v46 = vld [vmem:[#allocation6 + $0x148] sm:$0xff]   ;;  %v249_v48 = vld [vmem:[%s2226_s20 + $0x78] sm:$0xff] }
  0x65   : > { %1654 = vmatpush3.bf16.msra.mxu0 %v1879_v14  ;;  %1019 = vmatprep.mubr.bf16.mxu1 %v1622_v39  ;;  %v1900_v47 = vld [vmem:[#allocation6 + $0x108] sm:$0xff]   ;;  %v256_v49 = vld [vmem:[%s2226_s20 + $0xb0] sm:$0xff]  ;;  %v258_v51 = vld [vmem:[%s2226_s20 + $0xc0] sm:$0xff] }
  0x66   : > { %1694 = vmatpush3.bf16.msra.mxu1 %v1880_v15  ;;  %1655 = vmatprep.subr.bf16.mxu0 %v1881_v16  ;;  %v251_v50 = vld [vmem:[%s2226_s20 + $0x88] sm:$0xff]  ;;  %v1627_v52 = vpack.c.bf16 %v256_v49, %v249_v48  ;;  %v248_v54 = vld [vmem:[%s2226_s20 + $0x70] sm:$0xff]  ;;  %v250_v56 = vld [vmem:[%s2226_s20 + $0x80] sm:$0xff] }
  0x67   : > { %1695 = vmatprep.subr.bf16.mxu1 %v1882_v17  ;;  %v1629_v53 = vpack.c.bf16 %v258_v51, %v251_v50  ;;  %v255_v55 = vld [vmem:[%s2226_s20 + $0xa8] sm:$0xff]  ;;  %v257_v58 = vld [vmem:[%s2226_s20 + $0xb8] sm:$0xff]  ;;  %v1901_v60 = vld [vmem:[#allocation6 + $0x150] sm:$0xff]  }
  0x68   : > { %v1626_v57 = vpack.c.bf16 %v255_v55, %v248_v54  ;;  %v1628_v59 = vpack.c.bf16 %v257_v58, %v250_v56  ;;  %v1902_v61 = vld [vmem:[#allocation6 + $0x110] sm:$0xff]   ;;  %v1903_v62 = vld [vmem:[#allocation6 + $0x158] sm:$0xff]   ;;  %v263_v0 = vld [vmem:[%s2226_s20 + $0xe8] sm:$0xff] }
  0x69   : > { %1656 = vmatpush3.bf16.msra.mxu0 %v1883_v18  ;;  %v1904_v63 = vld [vmem:[#allocation6 + $0x118] sm:$0xff]   ;;  %v270_v1 = vld [vmem:[%s2226_s20 + $0x120] sm:$0xff]  ;;  %v272_v4 = vld [vmem:[%s2226_s20 + $0x130] sm:$0xff] }
  0x6a   : > { %1696 = vmatpush3.bf16.msra.mxu1 %v1884_v19  ;;  %1657 = vmatprep.subr.bf16.mxu0 %v1885_v20  ;;  %v1634_v2 = vpack.c.bf16 %v270_v1, %v263_v0  ;;  %v265_v3 = vld [vmem:[%s2226_s20 + $0xf8] sm:$0xff]  ;;  %v262_v5 = vld [vmem:[%s2226_s20 + $0xe0] sm:$0xff]  ;;  %v264_v8 = vld [vmem:[%s2226_s20 + $0xf0] sm:$0xff] }
  0x6b   : > { %1697 = vmatprep.subr.bf16.mxu1 %v1886_v21  ;;  %v1636_v6 = vpack.c.bf16 %v272_v4, %v265_v3  ;;  %v269_v7 = vld [vmem:[%s2226_s20 + $0x118] sm:$0xff]  ;;  %v271_v9 = vld [vmem:[%s2226_s20 + $0x128] sm:$0xff]  ;;  %v1905_v11 = vld [vmem:[#allocation6 + $0x160] sm:$0xff]  }
  0x6c   : > { %v1633_v10 = vpack.c.bf16 %v269_v7, %v262_v5  ;;  %v1635_v12 = vpack.c.bf16 %v271_v9, %v264_v8  ;;  %v1906_v13 = vld [vmem:[#allocation6 + $0x120] sm:$0xff]   ;;  %v1907_v14 = vld [vmem:[#allocation6 + $0x168] sm:$0xff]   ;;  %v277_v16 = vld [vmem:[%s2226_s20 + $0x158] sm:$0xff] }
  0x6d   : > { %1658 = vmatpush3.bf16.msra.mxu0 %v1887_v22  ;;  %v1908_v15 = vld [vmem:[#allocation6 + $0x128] sm:$0xff]   ;;  %v284_v17 = vld [vmem:[%s2226_s20 + $0x190] sm:$0xff]  ;;  %v286_v20 = vld [vmem:[%s2226_s20 + $0x1a0] sm:$0xff] }
  0x6e   : > { %1698 = vmatpush3.bf16.msra.mxu1 %v1888_v23  ;;  %1659 = vmatprep.subr.bf16.mxu0 %v1889_v24  ;;  %v279_v18 = vld [vmem:[%s2226_s20 + $0x168] sm:$0xff]  ;;  %v1641_v19 = vpack.c.bf16 %v284_v17, %v277_v16  ;;  %v276_v21 = vld [vmem:[%s2226_s20 + $0x150] sm:$0xff]  ;;  %v278_v24 = vld [vmem:[%s2226_s20 + $0x160] sm:$0xff] }
  0x6f   : > { %1699 = vmatprep.subr.bf16.mxu1 %v1890_v25  ;;  %v283_v22 = vld [vmem:[%s2226_s20 + $0x188] sm:$0xff]  ;;  %v1643_v23 = vpack.c.bf16 %v286_v20, %v279_v18  ;;  %v285_v25 = vld [vmem:[%s2226_s20 + $0x198] sm:$0xff]  ;;  %v246_v32 = vld [vmem:[%s2226_s20 + $0x60] sm:$0xff] }
  0x70   : > { %v281_v33 = vld [vmem:[%s2226_s20 + $0x178] sm:$0xff]  ;;  %v288_v34 = vld [vmem:[%s2226_s20 + $0x1b0] sm:$0xff]  ;;  %v238_v38 = vld [vmem:[%s2226_s20 + $0x20] sm:$0xff] }
  0x71   : > { %1660 = vmatpush3.bf16.msra.mxu0 %v1891_v26  ;;  %v1909_v26 = vld [vmem:[#allocation6 + $0x170] sm:$0xff]   ;;  %v1645_v36 = vpack.c.bf16 %v288_v34, %v281_v33  ;;  %v1912_v37 = vld [vmem:[#allocation6 + $0x138] sm:$0xff]   ;;  %v287_v41 = vld [vmem:[%s2226_s20 + $0x1a8] sm:$0xff] }
  0x72   : > { %1700 = vmatpush3.bf16.msra.mxu1 %v1892_v27  ;;  %1661 = vmatprep.subr.bf16.mxu0 %v1893_v28  ;;  %v1640_v27 = vpack.c.bf16 %v283_v22, %v276_v21  ;;  %v1642_v28 = vpack.c.bf16 %v285_v25, %v278_v24  ;;  %v245_v39 = vld [vmem:[%s2226_s20 + $0x58] sm:$0xff]  ;;  %v252_v51 = vld [vmem:[%s2226_s20 + $0x90] sm:$0xff]  ;;  %v267_v55 = vld [vmem:[%s2226_s20 + $0x108] sm:$0xff] }
  0x73   : > { %1701 = vmatprep.subr.bf16.mxu1 %v1894_v29  ;;  %v1910_v29 = vld [vmem:[#allocation6 + $0x130] sm:$0xff]   ;;  %v253_v42 = vld [vmem:[%s2226_s20 + $0x98] sm:$0xff]  ;;  %v274_v56 = vld [vmem:[%s2226_s20 + $0x140] sm:$0xff] }
  0x74   : > { %v261_v54 = vld [vmem:[%s2226_s20 + $0xd8] sm:$0xff]  ;;  %v275_v58 = vld [vmem:[%s2226_s20 + $0x148] sm:$0xff]  ;;  %v282_v1 = vld [vmem:[%s2226_s20 + $0x180] sm:$0xff] }
  0x75   : > { %1662 = vmatpush3.bf16.msra.mxu0 %v1895_v30  ;;  %v1911_v30 = vld [vmem:[#allocation6 + $0x178] sm:$0xff]  }
  0x76   : > { %1702 = vmatpush3.bf16.msra.mxu1 %v1896_v31  ;;  %1727 = vmatprep.subr.bf16.mxu0 %v1897_v44  ;;  %v239_v31 = vld [vmem:[%s2226_s20 + $0x28] sm:$0xff]  ;;  %v273_v0 = vld [vmem:[%s2226_s20 + $0x138] sm:$0xff] }
  0x77   : > { %1782 = vmatprep.subr.bf16.mxu1 %v1897_v44  ;;  %v1624_v35 = vpack.c.bf16 %v246_v32, %v239_v31  ;;  %v1913_v44 = vld [vmem:[#allocation6 + $0x180] sm:$0xff]  }
  0x78   : > { %955 = vmatmul.mubr.bf16.vlgmr.msra.gmra.mrb[0].mxu0 %v1619_v40  ;;  %v280_v40 = vld [vmem:[%s2226_s20 + $0x170] sm:$0xff] }
  0x79   : > { %1020 = vmatmul.mubr.bf16.vlgmr.msra.gmra.mrb[0].mxu1 %v1621_v43  ;;  %1728 = vmatpush3.bf16.msra.mxu0 %v1898_v45  ;;  %v260_v43 = vld [vmem:[%s2226_s20 + $0xd0] sm:$0xff]  ;;  %v1644_v48 = vpack.c.bf16 %v287_v41, %v280_v40 }
  0x7a   : > { %1790 = vmatpush3.bf16.msra.mxu1 %v1898_v45  ;;  %1729 = vmatprep.subr.bf16.mxu0 %v1899_v46  ;;  %v240_v45 = vld [vmem:[%s2226_s20 + $0x30] sm:$0xff]  ;;  %v1631_v49 = vpack.c.bf16 %v260_v43, %v253_v42 }
  0x7b   : > { %1783 = vmatprep.subr.bf16.mxu1 %v1899_v46  ;;  %962 = vmatprep.mubr.bf16.mxu0 %v1627_v52  ;;  %v247_v46 = vld [vmem:[%s2226_s20 + $0x68] sm:$0xff] }
  0x7c   : > { %1027 = vmatprep.mubr.bf16.mxu1 %v1629_v53  ;;  %v1625_v50 = vpack.c.bf16 %v247_v46, %v240_v45  ;;  %v259_v52 = vld [vmem:[%s2226_s20 + $0xc8] sm:$0xff]  ;;  %v254_v53 = vld [vmem:[%s2226_s20 + $0xa0] sm:$0xff] }
  0x7d   : > { %1730 = vmatpush3.bf16.msra.mxu0 %v1900_v47 }
  0x7e   : > { %1791 = vmatpush3.bf16.msra.mxu1 %v1900_v47  ;;  %1731 = vmatprep.subr.bf16.mxu0 %v1901_v60  ;;  %v1623_v47 = vpack.c.bf16 %v245_v39, %v238_v38 }
  0x7f   : > { %1784 = vmatprep.subr.bf16.mxu1 %v1901_v60  ;;  %v1632_v60 = vpack.c.bf16 %v261_v54, %v254_v53 }
  0x80   : > { %963 = vmatmul.mubr.bf16.gmra.mrb[4].mxu0 %v1626_v57  ;;  %v268_v57 = vld [vmem:[%s2226_s20 + $0x110] sm:$0xff] }
  0x81   : > { %1028 = vmatmul.mubr.bf16.gmra.mrb[4].mxu1 %v1628_v59  ;;  %1732 = vmatpush3.bf16.msra.mxu0 %v1902_v61  ;;  %v1630_v59 = vpack.c.bf16 %v259_v52, %v252_v51 }
  0x82   : > { %1792 = vmatpush3.bf16.msra.mxu1 %v1902_v61  ;;  %1733 = vmatprep.subr.bf16.mxu0 %v1903_v62  ;;  %v1638_v61 = vpack.c.bf16 %v274_v56, %v267_v55 }
  0x83   : > { %1785 = vmatprep.subr.bf16.mxu1 %v1903_v62  ;;  %970 = vmatprep.mubr.bf16.mxu0 %v1634_v2  ;;  %v1639_v62 = vpack.c.bf16 %v275_v58, %v268_v57  ;;  %v289_v2 = vld [vmem:[%s2226_s20 + $0x1b8] sm:$0xff] }
  0x84   : > { %1035 = vmatprep.mubr.bf16.mxu1 %v1636_v6  ;;  %v1646_v4 = vpack.c.bf16 %v289_v2, %v282_v1  ;;  %v1516_v6 = vld [vmem:[%s2368_s2] ss:$0 sm:$0xff] }
  0x85   : > { %1734 = vmatpush3.bf16.msra.mxu0 %v1904_v63 }
  0x86   : > { %1793 = vmatpush3.bf16.msra.mxu1 %v1904_v63  ;;  %1735 = vmatprep.subr.bf16.mxu0 %v1905_v11  ;;  %v266_v63 = vld [vmem:[%s2226_s20 + $0x100] sm:$0xff] }
  0x87   : > { %1786 = vmatprep.subr.bf16.mxu1 %v1905_v11  ;;  %v1637_v3 = vpack.c.bf16 %v273_v0, %v266_v63 }
  0x88   : > { %971 = vmatmul.mubr.bf16.gmra.mrb[8].mxu0 %v1633_v10 }
  0x89   : > { %1036 = vmatmul.mubr.bf16.gmra.mrb[8].mxu1 %v1635_v12  ;;  %1736 = vmatpush3.bf16.msra.mxu0 %v1906_v13 }
  0x8a   : > { %1794 = vmatpush3.bf16.msra.mxu1 %v1906_v13  ;;  %1737 = vmatprep.subr.bf16.mxu0 %v1907_v14 }
  0x8b   : > { %1787 = vmatprep.subr.bf16.mxu1 %v1907_v14  ;;  %978 = vmatprep.mubr.bf16.mxu0 %v1641_v19 }
  0x8c   : > { %1043 = vmatprep.mubr.bf16.mxu1 %v1643_v23 }
  0x8d   : > { %1738 = vmatpush3.bf16.msra.mxu0 %v1908_v15 }
  0x8e   : > { %1795 = vmatpush3.bf16.msra.mxu1 %v1908_v15  ;;  %1739 = vmatprep.subr.bf16.mxu0 %v1909_v26 }
  0x8f   : > { %1788 = vmatprep.subr.bf16.mxu1 %v1909_v26 }
  0x90   : > { %979 = vmatmul.mubr.bf16.gmra.mrb[12].mxu0 %v1640_v27 }
  0x91   : > { %1044 = vmatmul.mubr.bf16.gmra.mrb[12].mxu1 %v1642_v28  ;;  %1740 = vmatpush3.bf16.msra.mxu0 %v1910_v29 }
  0x92   : > { %1084 = vmatprep.mubr.bf16.mxu0 %v1624_v35  ;;  %1796 = vmatpush3.bf16.msra.mxu1 %v1910_v29 }
  0x93   : > { %1741 = vmatprep.subr.bf16.mxu0 %v1911_v30  ;;  %1789 = vmatprep.subr.bf16.mxu1 %v1911_v30 }
  0x94   : > { %1108 = vmatprep.mubr.bf16.mxu1 %v1645_v36 }
  0x95   : > { %1742 = vmatpush3.bf16.msra.mxu0 %v1912_v37 }
  0x96   : > { %1797 = vmatpush3.bf16.msra.mxu1 %v1912_v37 }
  0x97   : > { %1772 = vmatprep.subr.bf16.mxu1 %v1913_v44 }
  0x98   : > { %1085 = vmatmul.mubr.bf16.vlgmr.msra.gmra.mrb[16].mxu0 %v1623_v47 }
  0x99   : > { %1109 = vmatmul.mubr.bf16.vlgmr.msra.gmra.mrb[16].mxu1 %v1644_v48  ;;  %1092 = vmatprep.mubr.bf16.mxu0 %v1631_v49 }
  0x9a   : > { %1773 = vmatpush3.bf16.msra.mxu1 %v1913_v44  ;;  %1774 = vmatprep.mubr.msk.bf16.mxu1 %vm909_vm0, %v1625_v50 }
  0xa0   : > { %1093 = vmatmul.mubr.bf16.gmra.mrb[20].mxu0 %v1630_v59 }
  0xa1   : > { %1775 = vmatmul.mubr.msk.bf16.vlgmr.msra.gmra.mrb[20].mxu1 %vm909_vm0, %v1632_v60  ;;  %1100 = vmatprep.mubr.bf16.mxu0 %v1638_v61 }
  0xa2   : > { %1778 = vmatprep.mubr.msk.bf16.mxu1 %vm909_vm0, %v1639_v62 }
  0xa8   : > { %1101 = vmatmul.mubr.bf16.gmra.mrb[24].mxu0 %v1637_v3 }
  0xa9   : > { %1779 = vmatmul.mubr.msk.bf16.gmra.mrb[24].mxu1 %vm909_vm0, %v1646_v4 }
 0x14b   : > { %v1663_v5 = vpop.f32.mrb[0].mxu0 }
 0x14c   : > { %v1664_v7 = vpop.f32.mrb[1].mxu0  ;;  %v1703_v8 = vpop.f32.mrb[0].mxu1 }
 0x14d   : > { %v1665_v9 = vadd.f32 %v1664_v7, %v1663_v5  ;;  %v1666_v10 = vpop.f32.mrb[2].mxu0  ;;  %v1704_v11 = vpop.f32.mrb[1].mxu1 }
 0x14e   : > { %v1667_v12 = vpop.f32.mrb[3].mxu0  ;;  %v1705_v13 = vadd.f32 %v1704_v11, %v1703_v8  ;;  %v1706_v14 = vpop.f32.mrb[2].mxu1 }
 0x14f   : > { %v957_v15 = vadd.f32 %v1665_v9, %v1516_v6  ;;  %v1668_v16 = vadd.f32 %v1667_v12, %v1666_v10  ;;  %v1707_v17 = vpop.f32.mrb[3].mxu1 }
 0x150   : > { %v1708_v18 = vadd.f32 %v1707_v17, %v1706_v14 }
 0x151   : > { %v960_v19 = vadd.f32 %v1668_v16, %v1516_v6  ;;  %v1022_v20 = vadd.f32 %v1705_v13, %v957_v15 }
 0x153   : > { %v2299_v21 = vadd.f32 %v1708_v18, %v960_v19  ;;  %v1669_v22 = vpop.f32.mrb[4].mxu0 }
 0x154   : > { %v1670_v23 = vpop.f32.mrb[5].mxu0  ;;  %v1709_v24 = vpop.f32.mrb[4].mxu1 }
 0x155   : > { %v1671_v25 = vadd.f32 %v1670_v23, %v1669_v22  ;;  %v1672_v26 = vpop.f32.mrb[6].mxu0  ;;  %v1710_v27 = vpop.f32.mrb[5].mxu1 }
 0x156   : > { %v1673_v28 = vpop.f32.mrb[7].mxu0  ;;  %v1711_v29 = vadd.f32 %v1710_v27, %v1709_v24  ;;  %v1712_v30 = vpop.f32.mrb[6].mxu1  ;;  %v2054_v24 = vmov 1983009808  }
 0x157   : > { %v965_v31 = vadd.f32 %v1671_v25, %v1516_v6  ;;  %v1674_v32 = vadd.f32 %v1673_v28, %v1672_v26  ;;  %v1713_v33 = vpop.f32.mrb[7].mxu1  ;;  %v1187_v25 = vlaneseq }
 0x158   : > { %v1714_v34 = vadd.f32 %v1713_v33, %v1712_v30 }
 0x159   : > { %v968_v35 = vadd.f32 %v1674_v32, %v1516_v6  ;;  %v2301_v36 = vadd.f32 %v1711_v29, %v965_v31 }
 0x15b   : > { %v2303_v37 = vadd.f32 %v1714_v34, %v968_v35  ;;  %v1675_v38 = vpop.f32.mrb[8].mxu0  ;;  %v1188_v35 = vshrl.u32 %v1187_v25, 7 }
 0x15c   : > { %v1676_v39 = vpop.f32.mrb[9].mxu0  ;;  %v1715_v40 = vpop.f32.mrb[8].mxu1 }
 0x15d   : > { %v1677_v41 = vadd.f32 %v1676_v39, %v1675_v38  ;;  %v1678_v42 = vpop.f32.mrb[10].mxu0  ;;  %v1716_v43 = vpop.f32.mrb[9].mxu1 }
 0x15e   : > { %v1679_v44 = vpop.f32.mrb[11].mxu0  ;;  %v1717_v45 = vadd.f32 %v1716_v43, %v1715_v40  ;;  %v1718_v46 = vpop.f32.mrb[10].mxu1 }
 0x15f   : > { %v973_v47 = vadd.f32 %v1677_v41, %v1516_v6  ;;  %v1680_v48 = vadd.f32 %v1679_v44, %v1678_v42  ;;  %v1719_v49 = vpop.f32.mrb[11].mxu1 }
 0x160   : > { %v1720_v50 = vadd.f32 %v1719_v49, %v1718_v46 }
 0x161   : > { %v976_v51 = vadd.f32 %v1680_v48, %v1516_v6  ;;  %v2305_v52 = vadd.f32 %v1717_v45, %v973_v47 }
 0x163   : > { %v2307_v53 = vadd.f32 %v1720_v50, %v976_v51  ;;  %v1681_v54 = vpop.f32.mrb[12].mxu0 }
 0x164   : > { %v1682_v55 = vpop.f32.mrb[13].mxu0  ;;  %v1721_v56 = vpop.f32.mrb[12].mxu1 }
 0x165   : > { %v1683_v57 = vadd.f32 %v1682_v55, %v1681_v54  ;;  %v1684_v58 = vpop.f32.mrb[14].mxu0  ;;  %v1722_v59 = vpop.f32.mrb[13].mxu1  ;;  %v2055_v55 = vmov 1934713408  }
 0x166   : > { %v1685_v60 = vpop.f32.mrb[15].mxu0  ;;  %v1723_v61 = vadd.f32 %v1722_v59, %v1721_v56  ;;  %v1724_v62 = vpop.f32.mrb[14].mxu1  ;;  %v1249_v56 = vunpack.c.l.s4 %v2055_v55 }
 0x167   : > { %v981_v63 = vadd.f32 %v1683_v57, %v1516_v6  ;;  %v1686_v0 = vadd.f32 %v1685_v60, %v1684_v58  ;;  %v1725_v1 = vpop.f32.mrb[15].mxu1 }
 0x168   : > { %v1726_v2 = vadd.f32 %v1725_v1, %v1724_v62 }
 0x169   : > { %v984_v3 = vadd.f32 %v1686_v0, %v1516_v6  ;;  %v1046_v4 = vadd.f32 %v1723_v61, %v981_v63  ;;  %v1185_v6 = vunpack.c.l.s4 %v2054_v24 }
 0x16b   : > { %v1049_v5 = vadd.f32 %v1726_v2, %v984_v3  ;;  %v1743_v7 = vpop.f32.mrb[16].mxu0  ;;  %v1186_v34 = vunpack.c.0.s8 %v1185_v6 }
 0x16c   : > { %v1761_v8 = vpop.f32.mrb[16].mxu1  ;;  %v1744_v9 = vpop.f32.mrb[17].mxu0 }
 0x16d   : > { %v1745_v10 = vadd.f32 %v1744_v9, %v1743_v7  ;;  %v1762_v11 = vpop.f32.mrb[17].mxu1  ;;  %v1746_v12 = vpop.f32.mrb[18].mxu0  ;;  %v1189_v44 = vsub.s32 %v1186_v34, %v1188_v35 }
 0x16e   : > { %v1763_v13 = vadd.f32 %v1762_v11, %v1761_v8  ;;  %v1764_v14 = vpop.f32.mrb[18].mxu1  ;;  %v1747_v15 = vpop.f32.mrb[19].mxu0 }
 0x16f   : > { %v1748_v16 = vadd.f32 %v1747_v15, %v1746_v12  ;;  %v1765_v17 = vpop.f32.mrb[19].mxu1  ;;  %v1087_v18 = vadd.f32 %v1745_v10, %v1022_v20  ;;  %v1250_v12 = vunpack.c.0.s8 %v1249_v56 }
 0x170   : > { %v1766_v19 = vadd.f32 %v1765_v17, %v1764_v14  ;;  %v1111_v22 = vadd.f32 %v1763_v13, %v1046_v4 }
 0x171   : > { %v1090_v23 = vadd.f32 %v1748_v16, %v2299_v21 }
 0x172   : > { %v1114_v26 = vadd.f32 %v1766_v19, %v1049_v5 }
 0x173   : > { %v1749_v27 = vpop.f32.mrb[20].mxu0 }
 0x174   : > { %v1776_v28 = vpop.f32.mrb[20].mxu1  ;;  %v1750_v29 = vpop.f32.mrb[21].mxu0 }
 0x175   : > { %v1751_v30 = vadd.f32 %v1750_v29, %v1749_v27  ;;  %v1151_v31 = vpop.f32.mrb[21].mxu1  ;;  %v1752_v32 = vpop.f32.mrb[22].mxu0 }
 0x176   : > { %v1152_v33 = vadd.f32 %v1151_v31, %v1087_v18  ;;  %v1777_v38 = vpop.f32.mrb[22].mxu1  ;;  %v1753_v39 = vpop.f32.mrb[23].mxu0  ;;  %v1253_v18 = vsub.s32 %v1250_v12, %v1188_v35 }
 0x177   : > { %v1095_v20 = vadd.f32 %v1751_v30, %v2301_v36  ;;  %v1754_v40 = vadd.f32 %v1753_v39, %v1752_v32  ;;  %v1154_v41 = vpop.f32.mrb[23].mxu1 }
 0x178   : > { %v1155_v21 = vadd.f32 %v1154_v41, %v1090_v23 }
 0x179   : > { %v1160_v42 = vadd.f32 %v1776_v28, %v1095_v20  ;;  %v1098_v43 = vadd.f32 %v1754_v40, %v2303_v37 }
 0x17b   : > { %v1182_v45 = vcombine.low %v1152_v33, %v1160_v42  ;;  %v1183_v46 = vcombine.high %v1152_v33, %v1160_v42  ;;  %v1163_v47 = vadd.f32 %v1777_v38, %v1098_v43  ;;  %v1755_v48 = vpop.f32.mrb[24].mxu0 }
 0x17c   : > { %v1780_v49 = vpop.f32.mrb[24].mxu1  ;;  %v1756_v50 = vpop.f32.mrb[25].mxu0 }
 0x17d   : > { %v1198_v51 = vcombine.low %v1155_v21, %v1163_v47  ;;  %v1199_v54 = vcombine.high %v1155_v21, %v1163_v47  ;;  %v1167_v57 = vpop.f32.mrb[25].mxu1  ;;  %v1758_v58 = vpop.f32.mrb[26].mxu0  ;;  %v1190_v36 = vrot.slane %v1182_v45, %v1189_v44  ;;  %v1197_v59 = vrot.slane %v1183_v46, %v1189_v44 }
 0x17e   : > { %v1176_v60 = vadd.f32 %v1780_v49, %v1111_v22  ;;  %v1757_v61 = vadd.f32 %v1756_v50, %v1755_v48  ;;  %v1781_v62 = vpop.f32.mrb[26].mxu1  ;;  %v1759_v63 = vpop.f32.mrb[27].mxu0  ;;  %v2056_v46 = vmov 0.0  }
 0x17f   : > { %v1206_v37 = vrot.slane %v1198_v51, %v1189_v44  ;;  %v1213_v0 = vrot.slane %v1199_v54, %v1189_v44  ;;  %v1179_v1 = vadd.f32 %v1781_v62, %v1114_v26  ;;  %v1760_v2 = vadd.f32 %v1759_v63, %v1758_v58  ;;  %v1170_v3 = vpop.f32.mrb[27].mxu1 }
 0x180   : > { %v1103_v4 = vadd.f32 %v1757_v61, %v2305_v52 }
 0x181   : > { %v1246_v5 = vcombine.low %v1190_v36, %v1206_v37  ;;  %v1247_v7 = vcombine.high %v1190_v36, %v1206_v37  ;;  %v1262_v8 = vcombine.low %v1197_v59, %v1213_v0  ;;  %v1263_v9 = vcombine.high %v1197_v59, %v1213_v0 }
 0x182   : > { %v1168_v10 = vadd.f32 %v1167_v57, %v1103_v4  ;;  %v1106_v11 = vadd.f32 %v1760_v2, %v2307_v53 }
 0x183   : > { %v1254_v27 = vrot.slane %v1246_v5, %v1253_v18  ;;  %v1261_v28 = vrot.slane %v1247_v7, %v1253_v18  ;;  %v1270_v32 = vrot.slane %v1262_v8, %v1253_v18  ;;  %v1277_v33 = vrot.slane %v1263_v9, %v1253_v18 }
 0x184   : > { %v1214_v13 = vcombine.low %v1168_v10, %v1176_v60  ;;  %v1215_v14 = vcombine.high %v1168_v10, %v1176_v60  ;;  %v1171_v15 = vadd.f32 %v1170_v3, %v1106_v11 }
 0x186   : > { %v1230_v16 = vcombine.low %v1171_v15, %v1179_v1  ;;  %v1231_v17 = vcombine.high %v1171_v15, %v1179_v1  ;;  %v1222_v19 = vrot.slane %v1214_v13, %v1189_v44  ;;  %v1229_v22 = vrot.slane %v1215_v14, %v1189_v44 }
 0x188   : > { %v1238_v23 = vrot.slane %v1230_v16, %v1189_v44  ;;  %v1245_v24 = vrot.slane %v1231_v17, %v1189_v44  ;;  %v1614_v16 = vld [vmem:[%s2369_s3] ss:$0 sm:$0xff] }
 0x18a   : > { %v1278_v6 = vcombine.low %v1222_v19, %v1238_v23  ;;  %v1279_v52 = vcombine.high %v1222_v19, %v1238_v23  ;;  %v1294_v25 = vcombine.low %v1229_v22, %v1245_v24  ;;  %v1295_v26 = vcombine.high %v1229_v22, %v1245_v24 }
 0x18c   : > { %v1286_v29 = vrot.slane %v1278_v6, %v1253_v18  ;;  %v1293_v30 = vrot.slane %v1279_v52, %v1253_v18  ;;  %v1302_v53 = vrot.slane %v1294_v25, %v1253_v18  ;;  %v1309_v31 = vrot.slane %v1295_v26, %v1253_v18 }
 0x18e   : > { %v1310_v34 = vcombine.low %v1254_v27, %v1286_v29  ;;  %v1311_v38 = vcombine.high %v1254_v27, %v1286_v29  ;;  %v1312_v39 = vcombine.low %v1261_v28, %v1293_v30  ;;  %v1313_v35 = vcombine.high %v1261_v28, %v1293_v30 }
 0x18f   : > { %v1314_v20 = vcombine.low %v1270_v32, %v1302_v53  ;;  %v1315_v40 = vcombine.high %v1270_v32, %v1302_v53  ;;  %v1316_v41 = vcombine.low %v1277_v33, %v1309_v31  ;;  %v1317_v21 = vcombine.high %v1277_v33, %v1309_v31 }
 0x190   : > { %v1598_v42 = vadd.f32 -1.0, %v1310_v34 }
 0x192   : > { %vm1328_vm1 = vcmp.gt.f32.partialorder %v1598_v42, 0.0 }
 0x193   : > { %v1333_v43 = vsel %vm1328_vm1, %v1598_v42, %v1310_v34  ;;  %v1599_v47 = vsel %vm1328_vm1, 1.0, %v2056_v46 }
 0x194   : > { %v1334_v44 = vadd.f32 %v1333_v43, %v1311_v38 }
 0x196   : > { %v1600_v45 = vadd.f32 -1.0, %v1334_v44 }
 0x198   : > { %vm1336_vm2 = vcmp.gt.f32.partialorder %v1600_v45, 0.0 }
 0x199   : > { %v1342_v48 = vsel %vm1336_vm2, %v1600_v45, %v1334_v44  ;;  %v1601_v49 = vsel %vm1336_vm2, 1.0, %v2056_v46 }
 0x19a   : > { %v1343_v50 = vadd.f32 %v1342_v48, %v1312_v39  ;;  %v1339_v51 = vadd.f32 %v1601_v49, %v1599_v47 }
 0x19c   : > { %v1602_v54 = vadd.f32 -1.0, %v1343_v50 }
 0x19e   : > { %vm1345_vm3 = vcmp.gt.f32.partialorder %v1602_v54, 0.0 }
 0x19f   : > { %v1351_v55 = vsel %vm1345_vm3, %v1602_v54, %v1343_v50  ;;  %v1603_v56 = vsel %vm1345_vm3, 1.0, %v2056_v46 }
 0x1a0   : > { %v1352_v57 = vadd.f32 %v1351_v55, %v1313_v35  ;;  %v1348_v58 = vadd.f32 %v1603_v56, %v1339_v51 }
 0x1a2   : > { %v1604_v36 = vadd.f32 -1.0, %v1352_v57 }
 0x1a4   : > { %vm1354_vm4 = vcmp.gt.f32.partialorder %v1604_v36, 0.0 }
 0x1a5   : > { %v1360_v59 = vsel %vm1354_vm4, %v1604_v36, %v1352_v57  ;;  %v1605_v60 = vsel %vm1354_vm4, 1.0, %v2056_v46 }
 0x1a6   : > { %v1361_v61 = vadd.f32 %v1360_v59, %v1314_v20  ;;  %v1357_v62 = vadd.f32 %v1605_v60, %v1348_v58 }
 0x1a8   : > { %v1606_v63 = vadd.f32 -1.0, %v1361_v61 }
 0x1aa   : > { %vm1363_vm5 = vcmp.gt.f32.partialorder %v1606_v63, 0.0 }
 0x1ab   : > { %v1607_v37 = vsel %vm1363_vm5, 1.0, %v2056_v46  ;;  %v1369_v0 = vsel %vm1363_vm5, %v1606_v63, %v1361_v61 }
 0x1ac   : > { %v1366_v1 = vadd.f32 %v1607_v37, %v1357_v62  ;;  %v1370_v2 = vadd.f32 %v1369_v0, %v1315_v40 }
 0x1ae   : > { %v1608_v3 = vadd.f32 -1.0, %v1370_v2 }
 0x1b0   : > { %vm1372_vm6 = vcmp.gt.f32.partialorder %v1608_v3, 0.0 }
 0x1b1   : > { %v1609_v4 = vsel %vm1372_vm6, 1.0, %v2056_v46  ;;  %v1378_v5 = vsel %vm1372_vm6, %v1608_v3, %v1370_v2 }
 0x1b2   : > { %v1375_v7 = vadd.f32 %v1609_v4, %v1366_v1  ;;  %v1379_v8 = vadd.f32 %v1378_v5, %v1316_v41 }
 0x1b4   : > { %v1610_v9 = vadd.f32 -1.0, %v1379_v8 }
 0x1b6   : > { %vm1381_vm7 = vcmp.gt.f32.partialorder %v1610_v9, 0.0 }
 0x1b7   : > { %v1611_v10 = vsel %vm1381_vm7, 1.0, %v2056_v46  ;;  %v1387_v11 = vsel %vm1381_vm7, %v1610_v9, %v1379_v8 }
 0x1b8   : > { %v1384_v12 = vadd.f32 %v1611_v10, %v1375_v7  ;;  %v1388_v13 = vadd.f32 %v1387_v11, %v1317_v21 }
 0x1ba   : > { %v1612_v14 = vadd.f32 -1.0, %v1388_v13 }
 0x1bc   : > { %vm1390_vm8 = vcmp.gt.f32.partialorder %v1612_v14, 0.0 }
 0x1bd   : > { %v1613_v15 = vsel %vm1390_vm8, 1.0, %v2056_v46 }
 0x1be   : > { %v1393_v17 = vadd.f32 %v1613_v15, %v1384_v12 }
 0x1c0   : > { %v1401_v18 = vadd.f32 %v1614_v16, %v1393_v17 }
 0x1c2   : > { %1402 = vmax.xlane.f32.xlu0 %v1401_v18 }
 0x24f   : > { %v1403_v19 = vpop.xlane.xlu0 %1402 }
 0x250   : > { %v1404_v22 = vsub.f32 %v1401_v18, %v1403_v19 }
 0x252   : > { %v1405_v23 = vmul.f32 1.442695, %v1404_v22 }
 0x254   : > { %1914 = vpow2.f32 %v1405_v23 }
 0x25e   : > { %v1915_v24 = vpop.eup %1914 }
 0x25f   : > { %1407 = vadd.xlane.f32.xlu0 %v1915_v24 }
 0x2ec   : > { %v1408_v6 = vpop.xlane.xlu0 %1407 }
 0x2ed   : > { %1916 = vrcp.f32 %v1408_v6 }
 0x2f7   : > { %v1917_v52 = vpop.eup %1916 }
 0x2f8   : > { %v1410_v25 = vmul.f32 %v1917_v52, %v1915_v24 }
 0x2fa   : > { %1411 = vst [vmem:[%s231_s6] sm:$0xff] %v1410_v25 }
 0x2fb   : > { %1989 = shalt.err (!%p1986_p7)
}
 0x2fc   : > { %s1990_s12 = scalar_lea.hbm %s2322_s8, 128  ;;  %s1994_s23 = scalar_lea.hbm %s2370_s4, 256 }
 0x2fd   : > { %p1991_p9 = scmp.ne.s32.totalorder %s2322_s8, %s1990_s12  ;;  %p1995_p5 = scmp.lt.u32.totalorder %s2322_s8, %s2370_s4 }
 0x2fe   : > { %p1996_p11 = scmp.lt.u32.totalorder %s1994_s23, %s1990_s12  ;;  %p1998_p4 = scmp.lt.u32.totalorder %s1990_s12, %s2322_s8 }
 0x2ff   : > { %p1992_p2 = pnand %p1991_p9, %p2174_p12 }
 0x300   : > { %p1997_p1 = por %p1996_p11, %p1995_p5 }
 0x301   : > { %p1993_p0 = pneg %p1992_p2 }
 0x302   : > { %p1999_p6 = por %p1998_p4, %p1997_p1 }
 0x304   : > { %p2000_p8 = pnand %p1999_p6, %p1993_p0 }
 0x306   : > { %2003 = shalt.err (!%p2000_p8)
}
 0x307   : > { %1807 = dma.vmem_to_hbm [thread:$0]  (%p2174_p12), %s2324_s5, 128, %s2322_s8, %s1413_s28  }
 0x308 PF: > { %s1438_s29 = sand.u32 1, %s2034_s15   ;;  %p2385_p10 = scmp.ne.s32.totalorder %s2375_s22, 0 }
 0x309   : > { %p2386_p13 = scmp.ge.s32.totalorder %s2046_s18, 2  ;;  %s1439_s10 = scalar_lea.sflag [#allocation5], %s1438_s29 }
 0x30b   : > { %p1818_p3 = pnand %p2386_p13, %p2385_p10 }
 0x30d   : > { %2029 = dma.done.wait (!%p1818_p3), %s1439_s10, 128  }
 0x30e   : > { %2031 = vsyncadd (!%p1818_p3), %s1439_s10, 4294967168  ;;  %p18_p7 = scmp.ge.s32.totalorder %s2139_s27, 4   ;;  %s2387_s15 = smov %s2038_s16 }
 0x30f   : > { %s2388_s16 = smov %s2042_s17  ;;  %s2389_s17 = smov %s2170_s24 }
 0x310   : > { %s2390_s18 = smov %s2139_s27  ;;  %20 = sbr.rel (!%p18_p7) target bundleno = 6 (0x6), region = 92 }
 0x317   :  { %1444 = vsyncpa [#allocation4], 1 }
 0x318   :  { %1446 = vsyncpa [#allocation4 + $0x1], 1 }
 0x319   :  { %1447 = vsyncpa [#allocation7], 1 }
 0x31a   :  { %1448 = vsyncpa [#allocation5], 1 }
 0x31b   :  { %1450 = vsyncpa [#allocation5 + $0x1], 1 }

</bundles_post_ra>
